<compile_context>
chip_gen: v5e
topology: v5e:2x2
jax: 0.10.0
libtpu: 0.0.40
codegen_flags: <defaults>
</compile_context>

<pallas_src>
import functools

import jax
import jax.numpy as jnp
from jax.experimental import pallas as pl
from jax.experimental.pallas import tpu as pltpu


def _round_up(x, m):
    return ((x + m - 1) // m) * m


def _cdiv(a, b):
    return -(-a // b)


def _vmem_capacity_bytes():
    """Generation-aware VMEM capacity (fallback = v7x per-TC 64 MiB, the smallest)."""
    try:
        return int(pltpu.get_tpu_info().vmem_capacity_bytes)
    except Exception:
        return 64 * 1024 * 1024


# --------------------------------------------------------------------------- #
# Kernel
# --------------------------------------------------------------------------- #
def _node_transition_kernel(s_ref, w1_ref, b1_ref, w2_ref, b2_ref,
                            w3_ref, b3_ref, g_ref, bln_ref, o_ref, *, eps):
    # s_ref: (tm, D); w*_ref: (D, D) bf16; b*/g/bln: (1, D) f32; o_ref: (tm, D)
    s0 = s_ref[...]                       # residual copy kept in the INPUT dtype
    cdt = w1_ref.dtype                    # MXU compute dtype (bf16)

    # linear_1 + ReLU  (single-pass bf16 MXU, f32 accumulation)
    h = jnp.dot(s0.astype(cdt), w1_ref[...], preferred_element_type=jnp.float32)
    h = jnp.maximum(h + b1_ref[...], 0.0)

    # linear_2 + ReLU
    h = jnp.dot(h.astype(cdt), w2_ref[...], preferred_element_type=jnp.float32)
    h = jnp.maximum(h + b2_ref[...], 0.0)

    # linear_3 + bias + residual (cast s0 to f32 only here)
    h = jnp.dot(h.astype(cdt), w3_ref[...], preferred_element_type=jnp.float32)
    h = h + b3_ref[...] + s0.astype(jnp.float32)

    # LayerNorm over the feature axis, merged-reduction form: var = E[h^2] - mean^2.
    inv_d = 1.0 / h.shape[-1]
    mean = jnp.sum(h, axis=-1, keepdims=True) * inv_d
    mean_sq = jnp.sum(h * h, axis=-1, keepdims=True) * inv_d
    var = jnp.maximum(mean_sq - mean * mean, 0.0)
    inv = jax.lax.rsqrt(var + eps)
    y = (h - mean) * inv * g_ref[...] + bln_ref[...]
    o_ref[...] = y.astype(o_ref.dtype)


# --------------------------------------------------------------------------- #
# One-time parameter preparation (outside the per-call path)
# --------------------------------------------------------------------------- #
def prepare_node_transition_params(w1, b1, w2, b2, w3, b3, gamma, beta,
                                   *, compute_dtype=jnp.bfloat16):
    """Transpose PyTorch [out, in] weights to [in, out], cast them to the MXU compute
    dtype, and reshape bias / LN vectors to (1, D) f32.  Call ONCE per parameter set."""
    d = w1.shape[0]
    f32 = jnp.float32
    return (w1.T.astype(compute_dtype), b1.reshape(1, d).astype(f32),
            w2.T.astype(compute_dtype), b2.reshape(1, d).astype(f32),
            w3.T.astype(compute_dtype), b3.reshape(1, d).astype(f32),
            gamma.reshape(1, d).astype(f32), beta.reshape(1, d).astype(f32))


# --------------------------------------------------------------------------- #
# Wrapper
# --------------------------------------------------------------------------- #
@functools.partial(jax.jit, static_argnames=("eps", "tm"))
def node_transition(s, w1t, b1, w2t, b2, w3t, b3, gamma, beta, *,
                    eps=1e-5, tm=2048):
    """Fused NodeTransition forward.

    s:                [*, N_res, D]
    w1t/w2t/w3t:      [D, D]  ([in, out] layout, e.g. bf16 - from prepare_node_transition_params)
    b1/b2/b3:         [1, D]  f32
    gamma, beta:      [1, D]  f32
    Returns           [*, N_res, D] in s.dtype.
    """
    orig_shape = s.shape
    d = orig_shape[-1]
    m = 1
    for n in orig_shape[:-1]:
        m *= n
    s_flat = s.reshape(m, d)

    s_it = s.dtype.itemsize
    w_it = w1t.dtype.itemsize

    # ---- Tile-size selection: generation-aware VMEM budget -------------------------
    vmem_cap = _vmem_capacity_bytes()
    budget = int(0.8 * vmem_cap)                       # ~53 MiB v7x, ~107 MiB v5e/v6e
    # Fixed residents: single-buffered weights + vectors + slack for Mosaic scratch.
    fixed_bytes = 3 * d * d * w_it + 6 * d * 4 + (4 << 20)
    # Per-row streamed bytes (double-buffered in + out) + live f32 intermediates.
    per_row = (2 + 2) * d * s_it + 4 * d * 4
    tm_cap = max(32, (budget - fixed_bytes) // max(per_row, 1))

    tm_eff = min(tm, tm_cap, m)
    if tm_eff < m:
        tm_eff = max(32, (tm_eff // 32) * 32)          # keep sublane-packing legal
    grid_m = _cdiv(m, tm_eff)

    # v7x megacore: ensure the row axis actually splits across both TensorCores.
    if grid_m == 1 and m >= 1024:
        tm_eff = _round_up(_cdiv(m, 2), 32)
        grid_m = _cdiv(m, tm_eff)
    elif grid_m > 2 and grid_m % 2 == 1:
        cand = _round_up(_cdiv(m, grid_m + 1), 32)
        if cand >= 256:                                # don't shrink tiles too far
            tm_eff = cand
            grid_m = _cdiv(m, tm_eff)

    vmem_limit = budget

    # Advisory cost estimate so XLA schedules around the custom call.
    flops = 6 * m * d * d + 12 * m * d
    bytes_accessed = 2 * m * d * s_it + 3 * d * d * w_it + 6 * d * 4
    cost = pl.CostEstimate(flops=flops, transcendentals=m,
                           bytes_accessed=bytes_accessed)

    # Grid-invariant operands: single pipeline buffer (they never change block index).
    def _inv_spec(shape):
        return pl.BlockSpec(shape, lambda i: (0, 0), pipeline_mode=pl.Buffered(1))

    kernel = functools.partial(_node_transition_kernel, eps=eps)

    out_flat = pl.pallas_call(
        kernel,
        out_shape=jax.ShapeDtypeStruct((m, d), s.dtype),
        grid_spec=pltpu.PrefetchScalarGridSpec(
            num_scalar_prefetch=0,
            grid=(grid_m,),
            in_specs=[
                pl.BlockSpec((tm_eff, d), lambda i: (i, 0)),   # s rows (streamed)
                _inv_spec((d, d)),                             # w1
                _inv_spec((1, d)),                             # b1
                _inv_spec((d, d)),                             # w2
                _inv_spec((1, d)),                             # b2
                _inv_spec((d, d)),                             # w3
                _inv_spec((1, d)),                             # b3
                _inv_spec((1, d)),                             # gamma
                _inv_spec((1, d)),                             # beta
            ],
            out_specs=pl.BlockSpec((tm_eff, d), lambda i: (i, 0)),
        ),
        compiler_params=pltpu.CompilerParams(
            dimension_semantics=("parallel",),   # shards the row grid across v7x's 2 TCs
            vmem_limit_bytes=vmem_limit,
        ),
        cost_estimate=cost,
    )(s_flat, w1t, b1, w2t, b2, w3t, b3, gamma, beta)

    return out_flat.reshape(orig_shape)


# --------------------------------------------------------------------------- #
# Reference + self-test
# --------------------------------------------------------------------------- #
def _ref_node_transition(s, w1, b1, w2, b2, w3, b3, gamma, beta, eps=1e-5):
    """Pure-JAX reference mirroring the PyTorch forward (PyTorch [out, in] weights)."""
    h = jnp.maximum(jnp.dot(s, w1.T) + b1, 0.0)
    h = jnp.maximum(jnp.dot(h, w2.T) + b2, 0.0)
    h = jnp.dot(h, w3.T) + b3
    h = h + s
    mean = h.mean(axis=-1, keepdims=True)
    var = ((h - mean) ** 2).mean(axis=-1, keepdims=True)
    return (h - mean) / jnp.sqrt(var + eps) * gamma + beta


def _make_params(key, dim):
    ks = jax.random.split(key, 8)
    scale = 1.0 / (dim ** 0.5)
    w1 = jax.random.normal(ks[0], (dim, dim), jnp.float32) * scale
    b1 = jax.random.normal(ks[1], (dim,), jnp.float32) * 0.1
    w2 = jax.random.normal(ks[2], (dim, dim), jnp.float32) * scale
    b2 = jax.random.normal(ks[3], (dim,), jnp.float32) * 0.1
    w3 = jax.random.normal(ks[4], (dim, dim), jnp.float32) * scale
    b3 = jax.random.normal(ks[5], (dim,), jnp.float32) * 0.1
    gamma = 1.0 + 0.1 * jax.random.normal(ks[6], (dim,), jnp.float32)
    beta = 0.1 * jax.random.normal(ks[7], (dim,), jnp.float32)
    return w1, b1, w2, b2, w3, b3, gamma, beta


if __name__ == "__main__":
    key = jax.random.PRNGKey(0)
    k0, k1, k2, k3, k4, k5 = jax.random.split(key, 6)
    TOL = dict(atol=3e-2, rtol=3e-2)   # bf16 MXU pass vs XLA default-precision reference

    # ---- Test 1: small shape, single full-array block (grid = 1). ------------------
    batch, n_res, dim = 2, 8, 32
    s = jax.random.normal(k0, (batch, n_res, dim), jnp.float32)
    params = _make_params(k1, dim)
    prepped = prepare_node_transition_params(*params)

    out = jax.block_until_ready(node_transition(s, *prepped))
    ref = _ref_node_transition(s, *params)
    assert out.shape == (batch, n_res, dim)
    assert jnp.allclose(out, ref, **TOL), "mismatch vs reference (small)"

    # ---- Test 2: multi-step grid with a ragged (masked) final row tile. ------------
    batch2, n_res2, dim2 = 3, 100, 128        # M = 300 rows, tm = 256 -> grid = 2
    s2 = jax.random.normal(k2, (batch2, n_res2, dim2), jnp.float32)
    params2 = _make_params(k3, dim2)
    prepped2 = prepare_node_transition_params(*params2)

    out2 = jax.block_until_ready(node_transition(s2, *prepped2, tm=256))
    ref2 = _ref_node_transition(s2, *params2)
    assert out2.shape == (batch2, n_res2, dim2)
    assert jnp.allclose(out2, ref2, **TOL), "mismatch vs reference (tiled)"

    # ---- Test 3: M large enough to trigger the >=2-step (megacore) split path. -----
    batch3, n_res3, dim3 = 6, 256, 64         # M = 1536 rows -> split into 2 steps
    s3 = jax.random.normal(k4, (batch3, n_res3, dim3), jnp.float32)
    params3 = _make_params(k5, dim3)
    prepped3 = prepare_node_transition_params(*params3)

    out3 = jax.block_until_ready(node_transition(s3, *prepped3))
    ref3 = _ref_node_transition(s3, *params3)
    assert out3.shape == (batch3, n_res3, dim3)
    assert jnp.allclose(out3, ref3, **TOL), "mismatch vs reference (split)"

    print("KERNEL_OK")
</pallas_src>

<mosaic_0001>
module attributes {stable_mosaic.version = 11 : i64} {
  func.func @_node_transition_kernel(%arg0: i32, %arg1: memref<16x32xf32, #tpu.memory_space<vmem>>, %arg2: memref<32x32xbf16, #tpu.memory_space<vmem>>, %arg3: memref<1x32xf32, #tpu.memory_space<vmem>>, %arg4: memref<32x32xbf16, #tpu.memory_space<vmem>>, %arg5: memref<1x32xf32, #tpu.memory_space<vmem>>, %arg6: memref<32x32xbf16, #tpu.memory_space<vmem>>, %arg7: memref<1x32xf32, #tpu.memory_space<vmem>>, %arg8: memref<1x32xf32, #tpu.memory_space<vmem>>, %arg9: memref<1x32xf32, #tpu.memory_space<vmem>>, %arg10: memref<16x32xf32, #tpu.memory_space<vmem>>) attributes {dimension_semantics = [#tpu.dimension_semantics<parallel>], iteration_bounds = array<i64: 1>, scalar_prefetch = 0 : i64, scratch_operands = 0 : i64, tpu.core_type = #tpu.core_type<tc>, window_params = [{transform_indices = @transform_0, window_bounds = array<i64: 16, 32>}, {pipeline_mode = #tpu.pipeline_mode<synchronous>, transform_indices = @transform_1, window_bounds = array<i64: 32, 32>}, {pipeline_mode = #tpu.pipeline_mode<synchronous>, transform_indices = @transform_2, window_bounds = array<i64: 1, 32>}, {pipeline_mode = #tpu.pipeline_mode<synchronous>, transform_indices = @transform_3, window_bounds = array<i64: 32, 32>}, {pipeline_mode = #tpu.pipeline_mode<synchronous>, transform_indices = @transform_4, window_bounds = array<i64: 1, 32>}, {pipeline_mode = #tpu.pipeline_mode<synchronous>, transform_indices = @transform_5, window_bounds = array<i64: 32, 32>}, {pipeline_mode = #tpu.pipeline_mode<synchronous>, transform_indices = @transform_6, window_bounds = array<i64: 1, 32>}, {pipeline_mode = #tpu.pipeline_mode<synchronous>, transform_indices = @transform_7, window_bounds = array<i64: 1, 32>}, {pipeline_mode = #tpu.pipeline_mode<synchronous>, transform_indices = @transform_8, window_bounds = array<i64: 1, 32>}, {transform_indices = @transform_9, window_bounds = array<i64: 16, 32>}]} {
    %c0 = arith.constant 0 : index
    %c0_0 = arith.constant 0 : index
    %0 = vector.load %arg1[%c0, %c0_0] : memref<16x32xf32, #tpu.memory_space<vmem>>, vector<16x32xf32>
    %1 = arith.truncf %0 : vector<16x32xf32> to vector<16x32xbf16>
    %c0_1 = arith.constant 0 : index
    %c0_2 = arith.constant 0 : index
    %2 = vector.load %arg2[%c0_1, %c0_2] : memref<32x32xbf16, #tpu.memory_space<vmem>>, vector<32x32xbf16>
    %cst = arith.constant dense<0.000000e+00> : vector<16x32xf32>
    %3 = tpu.matmul %1, %2, %cst {dimension_numbers = #tpu.dot_dimension_numbers<[1], [0], [0], [1], [0, 0, 1, 1], [], []>} : vector<16x32xbf16>, vector<32x32xbf16>, vector<16x32xf32> -> vector<16x32xf32>
    %c0_3 = arith.constant 0 : index
    %c0_4 = arith.constant 0 : index
    %4 = vector.load %arg3[%c0_3, %c0_4] : memref<1x32xf32, #tpu.memory_space<vmem>>, vector<1x32xf32>
    %5 = vector.broadcast %4 : vector<1x32xf32> to vector<16x32xf32>
    %6 = arith.addf %3, %5 : vector<16x32xf32>
    %cst_5 = arith.constant 0.000000e+00 : f32
    %7 = vector.broadcast %cst_5 : f32 to vector<16x32xf32>
    %8 = arith.maximumf %6, %7 : vector<16x32xf32>
    %9 = arith.truncf %8 : vector<16x32xf32> to vector<16x32xbf16>
    %c0_6 = arith.constant 0 : index
    %c0_7 = arith.constant 0 : index
    %10 = vector.load %arg4[%c0_6, %c0_7] : memref<32x32xbf16, #tpu.memory_space<vmem>>, vector<32x32xbf16>
    %cst_8 = arith.constant dense<0.000000e+00> : vector<16x32xf32>
    %11 = tpu.matmul %9, %10, %cst_8 {dimension_numbers = #tpu.dot_dimension_numbers<[1], [0], [0], [1], [0, 0, 1, 1], [], []>} : vector<16x32xbf16>, vector<32x32xbf16>, vector<16x32xf32> -> vector<16x32xf32>
    %c0_9 = arith.constant 0 : index
    %c0_10 = arith.constant 0 : index
    %12 = vector.load %arg5[%c0_9, %c0_10] : memref<1x32xf32, #tpu.memory_space<vmem>>, vector<1x32xf32>
    %13 = vector.broadcast %12 : vector<1x32xf32> to vector<16x32xf32>
    %14 = arith.addf %11, %13 : vector<16x32xf32>
    %cst_11 = arith.constant 0.000000e+00 : f32
    %15 = vector.broadcast %cst_11 : f32 to vector<16x32xf32>
    %16 = arith.maximumf %14, %15 : vector<16x32xf32>
    %17 = arith.truncf %16 : vector<16x32xf32> to vector<16x32xbf16>
    %c0_12 = arith.constant 0 : index
    %c0_13 = arith.constant 0 : index
    %18 = vector.load %arg6[%c0_12, %c0_13] : memref<32x32xbf16, #tpu.memory_space<vmem>>, vector<32x32xbf16>
    %cst_14 = arith.constant dense<0.000000e+00> : vector<16x32xf32>
    %19 = tpu.matmul %17, %18, %cst_14 {dimension_numbers = #tpu.dot_dimension_numbers<[1], [0], [0], [1], [0, 0, 1, 1], [], []>} : vector<16x32xbf16>, vector<32x32xbf16>, vector<16x32xf32> -> vector<16x32xf32>
    %c0_15 = arith.constant 0 : index
    %c0_16 = arith.constant 0 : index
    %20 = vector.load %arg7[%c0_15, %c0_16] : memref<1x32xf32, #tpu.memory_space<vmem>>, vector<1x32xf32>
    %21 = vector.broadcast %20 : vector<1x32xf32> to vector<16x32xf32>
    %22 = arith.addf %19, %21 : vector<16x32xf32>
    %23 = arith.addf %22, %0 : vector<16x32xf32>
    %cst_17 = arith.constant dense<0.000000e+00> : vector<16xf32>
    %24 = vector.multi_reduction <add>, %23, %cst_17 [1] : vector<16x32xf32> to vector<16xf32>
    %25 = vector.shape_cast %24 : vector<16xf32> to vector<16x1xf32>
    %cst_18 = arith.constant 3.125000e-02 : f32
    %26 = vector.broadcast %cst_18 : f32 to vector<16x1xf32>
    %27 = arith.mulf %25, %26 : vector<16x1xf32>
    %28 = arith.mulf %23, %23 : vector<16x32xf32>
    %cst_19 = arith.constant dense<0.000000e+00> : vector<16xf32>
    %29 = vector.multi_reduction <add>, %28, %cst_19 [1] : vector<16x32xf32> to vector<16xf32>
    %30 = vector.shape_cast %29 : vector<16xf32> to vector<16x1xf32>
    %cst_20 = arith.constant 3.125000e-02 : f32
    %31 = vector.broadcast %cst_20 : f32 to vector<16x1xf32>
    %32 = arith.mulf %30, %31 : vector<16x1xf32>
    %33 = arith.mulf %27, %27 : vector<16x1xf32>
    %34 = arith.subf %32, %33 : vector<16x1xf32>
    %cst_21 = arith.constant 0.000000e+00 : f32
    %35 = vector.broadcast %cst_21 : f32 to vector<16x1xf32>
    %36 = arith.maximumf %34, %35 : vector<16x1xf32>
    %cst_22 = arith.constant 9.99999974E-6 : f32
    %37 = vector.broadcast %cst_22 : f32 to vector<16x1xf32>
    %38 = arith.addf %36, %37 : vector<16x1xf32>
    %39 = math.rsqrt %38 : vector<16x1xf32>
    %40 = vector.broadcast %27 : vector<16x1xf32> to vector<16x32xf32>
    %41 = arith.subf %23, %40 : vector<16x32xf32>
    %42 = vector.broadcast %39 : vector<16x1xf32> to vector<16x32xf32>
    %43 = arith.mulf %41, %42 : vector<16x32xf32>
    %c0_23 = arith.constant 0 : index
    %c0_24 = arith.constant 0 : index
    %44 = vector.load %arg8[%c0_23, %c0_24] : memref<1x32xf32, #tpu.memory_space<vmem>>, vector<1x32xf32>
    %45 = vector.broadcast %44 : vector<1x32xf32> to vector<16x32xf32>
    %46 = arith.mulf %43, %45 : vector<16x32xf32>
    %c0_25 = arith.constant 0 : index
    %c0_26 = arith.constant 0 : index
    %47 = vector.load %arg9[%c0_25, %c0_26] : memref<1x32xf32, #tpu.memory_space<vmem>>, vector<1x32xf32>
    %48 = vector.broadcast %47 : vector<1x32xf32> to vector<16x32xf32>
    %49 = arith.addf %46, %48 : vector<16x32xf32>
    %c0_27 = arith.constant 0 : index
    %c0_28 = arith.constant 0 : index
    %50 = vector.load %arg10[%c0_27, %c0_28] : memref<16x32xf32, #tpu.memory_space<vmem>>, vector<16x32xf32>
    tpu.vector_store %arg10[%c0_27, %c0_28], %49 {strides = array<i32>} : memref<16x32xf32, #tpu.memory_space<vmem>>, vector<16x32xf32>,
    return
  }
  func.func @transform_0(%arg0: i32) -> (i32, i32) {
    %c0_i32 = arith.constant 0 : i32
    %c0_i32_0 = arith.constant 0 : i32
    return %arg0, %c0_i32 : i32, i32
  }
  func.func @transform_1(%arg0: i32) -> (i32, i32) {
    %c0_i32 = arith.constant 0 : i32
    %c0_i32_0 = arith.constant 0 : i32
    %c0_i32_1 = arith.constant 0 : i32
    return %c0_i32, %c0_i32_0 : i32, i32
  }
  func.func @transform_2(%arg0: i32) -> (i32, i32) {
    %c0_i32 = arith.constant 0 : i32
    %c0_i32_0 = arith.constant 0 : i32
    %c0_i32_1 = arith.constant 0 : i32
    return %c0_i32, %c0_i32_0 : i32, i32
  }
  func.func @transform_3(%arg0: i32) -> (i32, i32) {
    %c0_i32 = arith.constant 0 : i32
    %c0_i32_0 = arith.constant 0 : i32
    %c0_i32_1 = arith.constant 0 : i32
    return %c0_i32, %c0_i32_0 : i32, i32
  }
  func.func @transform_4(%arg0: i32) -> (i32, i32) {
    %c0_i32 = arith.constant 0 : i32
    %c0_i32_0 = arith.constant 0 : i32
    %c0_i32_1 = arith.constant 0 : i32
    return %c0_i32, %c0_i32_0 : i32, i32
  }
  func.func @transform_5(%arg0: i32) -> (i32, i32) {
    %c0_i32 = arith.constant 0 : i32
    %c0_i32_0 = arith.constant 0 : i32
    %c0_i32_1 = arith.constant 0 : i32
    return %c0_i32, %c0_i32_0 : i32, i32
  }
  func.func @transform_6(%arg0: i32) -> (i32, i32) {
    %c0_i32 = arith.constant 0 : i32
    %c0_i32_0 = arith.constant 0 : i32
    %c0_i32_1 = arith.constant 0 : i32
    return %c0_i32, %c0_i32_0 : i32, i32
  }
  func.func @transform_7(%arg0: i32) -> (i32, i32) {
    %c0_i32 = arith.constant 0 : i32
    %c0_i32_0 = arith.constant 0 : i32
    %c0_i32_1 = arith.constant 0 : i32
    return %c0_i32, %c0_i32_0 : i32, i32
  }
  func.func @transform_8(%arg0: i32) -> (i32, i32) {
    %c0_i32 = arith.constant 0 : i32
    %c0_i32_0 = arith.constant 0 : i32
    %c0_i32_1 = arith.constant 0 : i32
    return %c0_i32, %c0_i32_0 : i32, i32
  }
  func.func @transform_9(%arg0: i32) -> (i32, i32) {
    %c0_i32 = arith.constant 0 : i32
    %c0_i32_0 = arith.constant 0 : i32
    return %arg0, %c0_i32 : i32, i32
  }
}

</mosaic_0001>

<bundles_post_ra>
// kernel: node_transition.1
= control target key start
LH: loop header
LB: loop body
LE: loop exit
PB: predicated region body
PF: predicated region fallthrough
CT: control target
= control target key end

     0   :  { %14 = vsyncpa [#allocation3], 0  ;;  %s588_s0 = inlined_call_operand.hbm [shape: f32[16,32], index: 0, kind: input, shape index: {}]   ;;  %s589_s1 = inlined_call_operand.hbm [shape: bf16[32,32], index: 1, kind: input, shape index: {}]   ;;  %s590_s2 = inlined_call_operand.vmem [shape: f32[1,32], index: 2, kind: input, shape index: {}]   ;;  %s591_s3 = inlined_call_operand.hbm [shape: bf16[32,32], index: 3, kind: input, shape index: {}]   ;;  %s592_s4 = inlined_call_operand.vmem [shape: f32[1,32], index: 4, kind: input, shape index: {}]   ;;  %s593_s5 = inlined_call_operand.hbm [shape: bf16[32,32], index: 5, kind: input, shape index: {}]   ;;  %s594_s6 = inlined_call_operand.vmem [shape: f32[1,32], index: 6, kind: input, shape index: {}]   ;;  %s595_s7 = inlined_call_operand.vmem [shape: f32[1,32], index: 7, kind: input, shape index: {}]   ;;  %s596_s8 = inlined_call_operand.vmem [shape: f32[1,32], index: 8, kind: input, shape index: {}]   ;;  %s597_s9 = inlined_call_operand.hbm [shape: f32[16,32], index: 9, kind: output, shape index: {}]  }
   0x1   :  { %15 = vsyncpa [#allocation6], 0 }
   0x2   :  { %16 = vsyncpa [#allocation9], 0  ;;  %s35_s11 = sshll.u32 %s589_s1, 4  ;;  %s36_s11 = int_to_ptr.hbm [resolvable:$true] %s35_s11 }
   0x3   :  { %17 = vsyncpa [#allocation4], 0  ;;  %s484_s12 = smov [#allocation5]   ;;  %s22_s16 = sshll.u32 %s588_s0, 4  ;;  %s23_s16 = int_to_ptr.hbm [resolvable:$true] %s22_s16 }
   0x4   :  { %s37_s13 = sshll.u32 %s484_s12, 4  ;;  %s485_s17 = smov 64   ;;  %s38_s13 = int_to_ptr.vmem [resolvable:$true] %s37_s13 }
   0x5   :  { %s486_s18 = smov 4   ;;  %s487_s19 = smov [#allocation2]  }
   0x6   :  { %43 = dma.hbm_to_vmem [thread:$0]  %s36_s11, 256, %s38_s13, [#allocation6], %s485_s17, %s485_s17, %s486_s18  }
   0x7   :  { %s24_s20 = sshll.u32 %s487_s19, 4  ;;  %s488_s21 = smov 128   ;;  %s25_s20 = int_to_ptr.vmem [resolvable:$true] %s24_s20 }
   0x8   :  { %s489_s22 = smov 8   ;;  %s50_s24 = sshll.u32 %s591_s3, 4  ;;  %s51_s24 = int_to_ptr.hbm [resolvable:$true] %s50_s24 }
   0x9   :  { %30 = dma.hbm_to_vmem [thread:$0]  %s23_s16, 256, %s25_s20, [#allocation3], %s488_s21, %s488_s21, %s489_s22  }
   0xa   :  { %s490_s25 = smov [#allocation7]   ;;  %s65_s28 = sshll.u32 %s593_s5, 4  ;;  %s66_s28 = int_to_ptr.hbm [resolvable:$true] %s65_s28 }
   0xb   :  { %s52_s0 = sshll.u32 %s490_s25, 4  ;;  %s491_s29 = smov [#allocation8]   ;;  %s53_s0 = int_to_ptr.vmem [resolvable:$true] %s52_s0 }
   0xc   :  { %58 = dma.hbm_to_vmem [thread:$0]  %s51_s24, 256, %s53_s0, [#allocation6], %s485_s17, %s485_s17, %s486_s18  }
   0xd   :  { %s67_s30 = sshll.u32 %s491_s29, 4  ;;  %s68_s30 = int_to_ptr.vmem [resolvable:$true] %s67_s30 }
   0xe   :  { %73 = dma.hbm_to_vmem [thread:$0]  %s66_s28, 256, %s68_s30, [#allocation9], %s485_s17, %s485_s17, %s486_s18  }
   0xf   :  { %476 = dma.done.wait [#allocation3], 256  }
  0x10   :  { %477 = vsyncadd [#allocation3], 4294967040 }
  0x11   :  { %478 = dma.done.wait [#allocation6], 512  }
  0x12   :  { %479 = vsyncadd [#allocation6], 4294966784 }
  0x13   :  { %480 = dma.done.wait [#allocation9], 256  }
  0x14   :  { %481 = vsyncadd [#allocation9], 4294967040  ;;  %v333_v0 = vld [vmem:[#allocation5 + $0x8] sm:$0xff]  ;;  %v332_v1 = vld [vmem:[#allocation5] sm:$0xff]  ;;  %vm120_vm0 = vcmask 261120   ;;  %s290_s18 = sshll.u32 %s597_s9, 4  ;;  %s291_s18 = int_to_ptr.hbm [resolvable:$true] %s290_s18 }
  0x15   :  { %v97_v2 = vld [vmem:[#allocation2] sm:$0xff]  ;;  %v98_v3 = vld [vmem:[#allocation2 + $0x8] sm:$0xff]  ;;  %130 = vmatpush.bf16.msra.mxu0 %v333_v0  ;;  %v337_v15 = vld [vmem:[#allocation8 + $0x8] sm:$0xff] }
  0x16   :  { %v99_v4 = vpack.c.bf16 %v98_v3, %v97_v2  ;;  %v335_v5 = vld [vmem:[#allocation7 + $0x8] sm:$0xff]  ;;  %v334_v6 = vld [vmem:[#allocation7] sm:$0xff]  ;;  %210 = vmatpush.bf16.msra.mxu2 %v337_v15  ;;  %v336_v16 = vld [vmem:[#allocation8] sm:$0xff] }
  0x17   :  { %170 = vmatpush.bf16.msra.mxu1 %v335_v5  ;;  %v347_v8 = vld [vmem:[%s590_s2] ss:$0 sm:$0xff] }
  0x18   :  { %v348_v18 = vld [vmem:[%s592_s4] ss:$0 sm:$0xff] }
  0x19   :  { %131 = vmatpush.bf16.msra.mxu0 %v332_v1  ;;  %v349_v25 = vld [vmem:[%s594_s6] ss:$0 sm:$0xff] }
  0x1a   :  { %211 = vmatpush.bf16.msra.mxu2 %v336_v16  ;;  %v350_v63 = vld [vmem:[%s595_s7] ss:$0 sm:$0xff]  ;;  %s492_s7 = smov [#allocation10]  }
  0x1b   :  { %171 = vmatpush.bf16.msra.mxu1 %v334_v6  ;;  %s288_s15 = sshll.u32 %s492_s7, 4  ;;  %s289_s15 = int_to_ptr.vmem [resolvable:$true] %s288_s15 }
  0x1c   :  { %313 = vmatmul.msk.bf16.vlgmr.msra.gmra.mxu0 %vm120_vm0, %v99_v4 }
  0x99   :  { %v133_v7 = vpop.f32.mrf.mxu0 }
  0x9a   :  { %v134_v9 = vadd.f32 %v347_v8, %v133_v7 }
  0x9c   :  { %v138_v12 = vmax.f32 %v134_v9, 0.0 }
  0xa1   :  { %v135_v10 = vpop.f32.mrf.mxu0 }
  0xa2   :  { %v136_v11 = vadd.f32 %v347_v8, %v135_v10 }
  0xa4   :  { %v139_v13 = vmax.f32 %v136_v11, 0.0 }
  0xa6   :  { %v140_v14 = vpack.c.bf16 %v139_v13, %v138_v12 }
  0xa8   :  { %322 = vmatmul.msk.bf16.vlgmr.msra.gmra.mxu1 %vm120_vm0, %v140_v14 }
 0x125   :  { %v173_v17 = vpop.f32.mrf.mxu1 }
 0x126   :  { %v174_v19 = vadd.f32 %v348_v18, %v173_v17 }
 0x128   :  { %v178_v22 = vmax.f32 %v174_v19, 0.0 }
 0x12d   :  { %v175_v20 = vpop.f32.mrf.mxu1 }
 0x12e   :  { %v176_v21 = vadd.f32 %v348_v18, %v175_v20 }
 0x130   :  { %v179_v23 = vmax.f32 %v176_v21, 0.0 }
 0x132   :  { %v180_v24 = vpack.c.bf16 %v179_v23, %v178_v22 }
 0x134   :  { %331 = vmatmul.msk.bf16.vlgmr.msra.gmra.mxu2 %vm120_vm0, %v180_v24 }
 0x1b7   :  { %v213_v26 = vpop.f32.mrf.mxu2 }
 0x1b8   :  { %v214_v27 = vadd.f32 %v349_v25, %v213_v26 }
 0x1ba   :  { %v218_v28 = vadd.f32 %v214_v27, %v97_v2 }
 0x1bc   :  { %v220_v29 = vsel %vm120_vm0, %v218_v28, 0.0  ;;  %v228_v30 = vmul.f32 %v218_v28, %v218_v28 }
 0x1bd   :  { %221 = vadd.xlane.f32.xlu0 %v220_v29 }
 0x1be   :  { %v230_v31 = vsel %vm120_vm0, %v228_v30, 0.0 }
 0x1bf   :  { %v215_v32 = vpop.f32.mrf.mxu2  ;;  %231 = vadd.xlane.f32.xlu1 %v230_v31 }
 0x1c0   :  { %v216_v33 = vadd.f32 %v349_v25, %v215_v32 }
 0x1c2   :  { %v219_v34 = vadd.f32 %v216_v33, %v98_v3  ;;  %v351_v3 = vld [vmem:[%s596_s8] ss:$0 sm:$0xff] }
 0x1c4   :  { %v223_v35 = vsel %vm120_vm0, %v219_v34, 0.0  ;;  %v229_v36 = vmul.f32 %v219_v34, %v219_v34 }
 0x1c5   :  { %224 = vadd.xlane.f32.xlu0 %v223_v35 }
 0x1c6   :  { %v233_v37 = vsel %vm120_vm0, %v229_v36, 0.0 }
 0x1c7   :  { %234 = vadd.xlane.f32.xlu1 %v233_v37 }
 0x230   :  { %v222_v38 = vpop.xlane.xlu0 %221 }
 0x231   :  { %v226_v39 = vmul.f32 0.03125, %v222_v38 }
 0x232   :  { %v232_v40 = vpop.xlane.xlu1 %231 }
 0x233   :  { %v238_v41 = vmul.f32 %v226_v39, %v226_v39  ;;  %v236_v42 = vmul.f32 0.03125, %v232_v40  ;;  %v266_v61 = vsub.f32 %v218_v28, %v226_v39 }
 0x235   :  { %v240_v43 = vsub.f32 %v236_v42, %v238_v41 }
 0x237   :  { %v242_v44 = vmax.f32 %v240_v43, 0.0 }
 0x238   :  { %v225_v45 = vpop.xlane.xlu0 %224 }
 0x239   :  { %v244_v46 = vadd.f32 1e-05, %v242_v44  ;;  %v227_v47 = vmul.f32 0.03125, %v225_v45 }
 0x23a   :  { %v235_v48 = vpop.xlane.xlu1 %234 }
 0x23b   :  { %352 = vrsqrt.f32 %v244_v46  ;;  %v239_v49 = vmul.f32 %v227_v47, %v227_v47  ;;  %v237_v50 = vmul.f32 0.03125, %v235_v48  ;;  %vm252_vm2 = vweird.f32 %v244_v46 }
 0x23c   :  { %v267_v9 = vsub.f32 %v219_v34, %v227_v47 }
 0x23d   :  { %v241_v51 = vsub.f32 %v237_v50, %v239_v49 }
 0x23f   :  { %v243_v52 = vmax.f32 %v241_v51, 0.0 }
 0x241   :  { %v353_v53 = vpop.eup %352  ;;  %v245_v55 = vadd.f32 1e-05, %v243_v52 }
 0x242   :  { %v247_v54 = vmul.f32 %v353_v53, %v244_v46  ;;  %vm253_vm1 = vweird.f32 %v353_v53 }
 0x243   :  { %354 = vrsqrt.f32 %v245_v55  ;;  %vm254_vm3 = vmor %vm252_vm2, %vm253_vm1  ;;  %vm262_vm5 = vweird.f32 %v245_v55 }
 0x244   :  { %v248_v56 = vmul.f32 %v353_v53, %v247_v54 }
 0x246   :  { %v249_v57 = vmul.f32 0.5, %v248_v56 }
 0x248   :  { %v250_v58 = vsub.f32 1.5, %v249_v57 }
 0x249   :  { %v355_v59 = vpop.eup %354 }
 0x24a   :  { %v251_v60 = vmul.f32 %v353_v53, %v250_v58  ;;  %v257_v62 = vmul.f32 %v355_v59, %v245_v55  ;;  %vm263_vm4 = vweird.f32 %v355_v59 }
 0x24b   :  { %vm264_vm6 = vmor %vm262_vm5, %vm263_vm4 }
 0x24c   :  { %v255_v0 = vsel %vm254_vm3, %v353_v53, %v251_v60  ;;  %v258_v2 = vmul.f32 %v355_v59, %v257_v62 }
 0x24d   :  { %v268_v1 = vmul.f32 %v266_v61, %v255_v0 }
 0x24e   :  { %v259_v4 = vmul.f32 0.5, %v258_v2 }
 0x24f   :  { %v274_v5 = vmul.f32 %v350_v63, %v268_v1 }
 0x250   :  { %v260_v6 = vsub.f32 1.5, %v259_v4 }
 0x251   :  { %v280_v7 = vadd.f32 %v351_v3, %v274_v5 }
 0x252   :  { %v261_v8 = vmul.f32 %v355_v59, %v260_v6 }
 0x253   :  { %282 = vst.msk [vmem:[#allocation10] sm:$0xff] %vm120_vm0, %v280_v7 }
 0x254   :  { %v265_v10 = vsel %vm264_vm6, %v355_v59, %v261_v8 }
 0x255   :  { %v269_v11 = vmul.f32 %v267_v9, %v265_v10 }
 0x257   :  { %v275_v12 = vmul.f32 %v350_v63, %v269_v11 }
 0x259   :  { %v281_v13 = vadd.f32 %v351_v3, %v275_v12 }
 0x25b   :  { %283 = vst.msk [vmem:[#allocation10 + $0x8] sm:$0xff] %vm120_vm0, %v281_v13 }
 0x25c   :  { %296 = dma.vmem_to_hbm [thread:$0]  %s289_s15, 256, %s291_s18, [#allocation4], %s488_s21, %s488_s21, %s489_s22  }
 0x25d   :  { %482 = dma.done.wait [#allocation4], 256  }
 0x25e   :  { %483 = vsyncadd [#allocation4], 4294967040 }
 0x25f   :  { %301 = vsyncpa [#allocation3], 1 }
 0x260   :  { %302 = vsyncpa [#allocation6], 1 }
 0x261   :  { %303 = vsyncpa [#allocation9], 1 }
 0x262   :  { %304 = vsyncpa [#allocation4], 1 }

</bundles_post_ra>
